<compile_context>
chip_gen: v7x
topology: tpu7x:2x2x1
jax: 0.10.0
libtpu: 0.0.40
codegen_flags: <defaults>
</compile_context>

<pallas_src>
import math

import jax
import jax.numpy as jnp
from jax.experimental import pallas as pl
from jax.experimental.pallas import tpu as pltpu

_LANE = 128
_SUBLANE = 8


def _gelu_exact(x):
    # PyTorch nn.GELU() default = exact erf formulation (long VPU polynomial).
    return 0.5 * x * (1.0 + jax.lax.erf(x * (1.0 / math.sqrt(2.0))))


def _gelu_tanh(x):
    # tanh-approximate GELU: the tanh goes to the EUP (its own bundle slot),
    # leaving only a few VALU ops. ~1e-3 relative deviation vs. exact erf.
    c = math.sqrt(2.0 / math.pi)
    return 0.5 * x * (1.0 + jnp.tanh(c * (x + 0.044715 * (x * x * x))))


def _make_mlp_kernel(gelu_fn):
    def mlp_kernel(x_ref, w1_ref, b1_ref, w2_ref, b2_ref, w3_ref, b3_ref,
                   out_ref):
        # Weights VMEM-resident bf16; b1/b2 carry the epilogue dtype
        # (f32 on v5e, bf16 on v6e/v7x); b3/out stay f32.
        w1 = w1_ref[...]
        w2 = w2_ref[...]
        w3 = w3_ref[...]
        epi_dtype = b1_ref.dtype

        x = x_ref[...].astype(w1.dtype)            # no-op if x already bf16

        # ---- Linear(input_dim, 128) with eval-mode BatchNorm1d folded in ----
        h = jnp.dot(x, w1, preferred_element_type=jnp.float32)
        h = gelu_fn(h.astype(epi_dtype) + b1_ref[...])
        # Dropout(0.3): identity in eval mode.
        # TODO(synk): training-mode dropout / batch statistics not implemented.

        # ---- Linear(128, 64) ----
        h = jnp.dot(h.astype(w2.dtype), w2, preferred_element_type=jnp.float32)
        h = gelu_fn(h.astype(epi_dtype) + b2_ref[...])
        # Dropout(0.3): identity in eval mode.

        # ---- Linear(64, num_classes), columns lane-padded to 128 ----
        out = jnp.dot(h.astype(w3.dtype), w3,
                      preferred_element_type=jnp.float32) + b3_ref[...]
        out_ref[...] = out.astype(out_ref.dtype)

    return mlp_kernel


def _round_up(n, m):
    return ((n + m - 1) // m) * m


def _default_epilogue_dtype():
    # v5e and older have no bf16 VPU/EUP -> keep the element-wise epilogue in
    # f32 there; v6e/v7x support bf16 element-wise -> halve VALU work & vregs.
    try:
        kind = jax.devices()[0].device_kind.lower()
    except Exception:
        return jnp.float32
    if any(v in kind for v in ("v2", "v3", "v4", "v5")):
        return jnp.float32
    return jnp.bfloat16


def mlp_forward(x, params, *, block_rows=1024, matmul_dtype=jnp.bfloat16,
                epilogue_dtype=None, approximate_gelu=True):
    """Fused MLP forward. x: (B, input_dim), f32 (or bf16 if produced upstream)."""
    (w1, b1, gamma, beta, mean, var, w2, b2, w3, b3) = params
    B, D_in = x.shape
    H1 = w1.shape[1]
    H2 = w2.shape[1]
    num_classes = w3.shape[1]

    if epilogue_dtype is None:
        epilogue_dtype = _default_epilogue_dtype()
    gelu_fn = _gelu_tanh if approximate_gelu else _gelu_exact

    # ---- Fold eval-mode BatchNorm1d(128) into the first Linear (exact) ----
    eps = 1e-5
    scale = gamma * jax.lax.rsqrt(var + eps)              # (1, 128)
    w1_eff = w1 * scale                                   # (D_in, 128)
    b1_eff = (b1 - mean) * scale + beta                   # (1, 128)

    # ---- Lane-dense output: pad num_classes up to a full 128-lane vreg ----
    NC_pad = _round_up(max(num_classes, 1), _LANE)
    w3_pad = jnp.pad(w3, ((0, 0), (0, NC_pad - num_classes)))
    b3_pad = jnp.pad(b3, ((0, 0), (0, NC_pad - num_classes)))

    # MXU operands in bf16 (f32 accumulation); epilogue biases in epilogue dtype.
    w1_m = w1_eff.astype(matmul_dtype)
    w2_m = w2.astype(matmul_dtype)
    w3_m = w3_pad.astype(matmul_dtype)
    b1_e = b1_eff.astype(epilogue_dtype)
    b2_e = b2.astype(epilogue_dtype)
    b3_f = b3_pad.astype(jnp.float32)

    # ---- Batch tiling ----
    # Per-row VMEM cost: double-buffered x tile (lane-padded to 128 lanes),
    # double-buffered padded out tile, plus the f32 intermediates.
    x_bytes = x.dtype.itemsize
    bytes_per_row = (2 * max(D_in, _LANE) * x_bytes + 2 * NC_pad * 4
                     + (H1 + H2 + _LANE) * 4)
    vmem_budget = 32 * 1024 * 1024                        # safe on v5e..v7x
    max_tb = max(_SUBLANE,
                 ((vmem_budget // 2) // bytes_per_row) // _SUBLANE * _SUBLANE)

    TB = min(block_rows, _round_up(B, _SUBLANE), max_tb)
    # Prefer >= 2 grid steps so the "parallel" batch axis can shard across the
    # 2 TensorCores of a v7x chip instead of idling one.
    if (_round_up(B, TB) // TB) < 2 and B > 4 * _SUBLANE:
        TB = _round_up((B + 1) // 2, _SUBLANE)
    B_pad = _round_up(B, TB)
    if B_pad != B:
        x = jnp.pad(x, ((0, B_pad - B), (0, 0)))
    grid = (B_pad // TB,)

    def const_spec(a):
        return pl.BlockSpec(a.shape, lambda i: (0, 0))    # VMEM-resident

    # Advisory cost estimate for XLA's scheduler.
    flops = 2 * B_pad * (D_in * H1 + H1 * H2 + H2 * NC_pad)
    transcendentals = B_pad * (H1 + H2)                   # one tanh/erf per act
    bytes_accessed = (
        B_pad * D_in * x_bytes + 4 * B_pad * NC_pad
        + sum(int(a.size) * a.dtype.itemsize
              for a in (w1_m, b1_e, w2_m, b2_e, w3_m, b3_f)))

    out = pl.pallas_call(
        _make_mlp_kernel(gelu_fn),
        out_shape=jax.ShapeDtypeStruct((B_pad, NC_pad), jnp.float32),
        grid=grid,
        in_specs=[
            pl.BlockSpec((TB, D_in), lambda i: (i, 0)),   # x: tiled over batch
            const_spec(w1_m), const_spec(b1_e),           # weights: resident
            const_spec(w2_m), const_spec(b2_e),
            const_spec(w3_m), const_spec(b3_f),
        ],
        out_specs=pl.BlockSpec((TB, NC_pad), lambda i: (i, 0)),
        compiler_params=pltpu.CompilerParams(
            dimension_semantics=("parallel",),
            vmem_limit_bytes=vmem_budget),
        cost_estimate=pl.CostEstimate(
            flops=flops,
            transcendentals=transcendentals,
            bytes_accessed=bytes_accessed),
    )(x, w1_m, b1_e, w2_m, b2_e, w3_m, b3_f)

    return out[:B, :num_classes]


def init_params(key, input_dim, num_classes, hidden_dim=64):
    # Deterministic synthetic init (PyTorch-like uniform fan-in bounds).
    ks = jax.random.split(key, 6)

    def linear(kw, kb, fan_in, fan_out):
        bound = 1.0 / math.sqrt(fan_in)
        w = jax.random.uniform(kw, (fan_in, fan_out), jnp.float32, -bound, bound)
        b = jax.random.uniform(kb, (1, fan_out), jnp.float32, -bound, bound)
        return w, b

    w1, b1 = linear(ks[0], ks[1], input_dim, 128)
    w2, b2 = linear(ks[2], ks[3], 128, hidden_dim)
    w3, b3 = linear(ks[4], ks[5], hidden_dim, num_classes)

    # BatchNorm1d(128) defaults: weight=1, bias=0, running_mean=0, running_var=1
    gamma = jnp.ones((1, 128), jnp.float32)
    beta = jnp.zeros((1, 128), jnp.float32)
    mean = jnp.zeros((1, 128), jnp.float32)
    var = jnp.ones((1, 128), jnp.float32)

    return (w1, b1, gamma, beta, mean, var, w2, b2, w3, b3)


def reference_forward(x, params, *, matmul_dtype=jnp.float32,
                      epilogue_dtype=jnp.float32, approximate_gelu=False):
    """Pure-JAX reference; defaults mirror the PyTorch module (f32, exact GELU)."""
    (w1, b1, gamma, beta, mean, var, w2, b2, w3, b3) = params
    gelu_fn = _gelu_tanh if approximate_gelu else _gelu_exact
    eps = 1e-5
    scale = gamma * jax.lax.rsqrt(var + eps)
    w1_eff = (w1 * scale).astype(matmul_dtype)
    b1_eff = ((b1 - mean) * scale + beta).astype(epilogue_dtype)
    md, ed = matmul_dtype, epilogue_dtype
    h = jnp.dot(x.astype(md), w1_eff, preferred_element_type=jnp.float32)
    h = gelu_fn(h.astype(ed) + b1_eff)
    h = jnp.dot(h.astype(md), w2.astype(md), preferred_element_type=jnp.float32)
    h = gelu_fn(h.astype(ed) + b2.astype(ed))
    return jnp.dot(h.astype(md), w3.astype(md),
                   preferred_element_type=jnp.float32) + b3


if __name__ == "__main__":
    batch = 8
    input_dim = 32
    num_classes = 7

    key = jax.random.PRNGKey(0)
    kx, kp = jax.random.split(key)
    x = jax.random.normal(kx, (batch, input_dim), jnp.float32)
    params = init_params(kp, input_dim, num_classes)

    out = jax.block_until_ready(mlp_forward(x, params))
    assert out.shape == (batch, num_classes)

    # Tight check vs a reference mirroring the kernel's dtype / GELU choices.
    epi = _default_epilogue_dtype()
    ref_mirror = reference_forward(x, params, matmul_dtype=jnp.bfloat16,
                                   epilogue_dtype=epi, approximate_gelu=True)
    assert jnp.allclose(out, ref_mirror, atol=1e-2, rtol=1e-2), "mirror-ref mismatch"

    # Loose sanity check vs the full-f32 exact-erf (PyTorch-equivalent) forward.
    ref_f32 = reference_forward(x, params)
    assert jnp.allclose(out, ref_f32, atol=5e-2, rtol=5e-2), "f32-ref mismatch"

    print("KERNEL_OK")
</pallas_src>

<mosaic_0001>
module attributes {stable_mosaic.version = 11 : i64} {
  func.func @mlp_kernel(%arg0: i32, %arg1: memref<8x32xf32, #tpu.memory_space<vmem>>, %arg2: memref<32x128xbf16, #tpu.memory_space<vmem>>, %arg3: memref<1x128xbf16, #tpu.memory_space<vmem>>, %arg4: memref<128x64xbf16, #tpu.memory_space<vmem>>, %arg5: memref<1x64xbf16, #tpu.memory_space<vmem>>, %arg6: memref<64x128xbf16, #tpu.memory_space<vmem>>, %arg7: memref<1x128xf32, #tpu.memory_space<vmem>>, %arg8: memref<8x128xf32, #tpu.memory_space<vmem>>) attributes {dimension_semantics = [#tpu.dimension_semantics<parallel>], iteration_bounds = array<i64: 1>, scalar_prefetch = 0 : i64, scratch_operands = 0 : i64, tpu.core_type = #tpu.core_type<tc>, window_params = [{transform_indices = @transform_0, window_bounds = array<i64: 8, 32>}, {pipeline_mode = #tpu.pipeline_mode<synchronous>, transform_indices = @transform_1, window_bounds = array<i64: 32, 128>}, {pipeline_mode = #tpu.pipeline_mode<synchronous>, transform_indices = @transform_2, window_bounds = array<i64: 1, 128>}, {pipeline_mode = #tpu.pipeline_mode<synchronous>, transform_indices = @transform_3, window_bounds = array<i64: 128, 64>}, {pipeline_mode = #tpu.pipeline_mode<synchronous>, transform_indices = @transform_4, window_bounds = array<i64: 1, 64>}, {pipeline_mode = #tpu.pipeline_mode<synchronous>, transform_indices = @transform_5, window_bounds = array<i64: 64, 128>}, {pipeline_mode = #tpu.pipeline_mode<synchronous>, transform_indices = @transform_6, window_bounds = array<i64: 1, 128>}, {transform_indices = @transform_7, window_bounds = array<i64: 8, 128>}]} {
    %c0 = arith.constant 0 : index
    %c0_0 = arith.constant 0 : index
    %0 = vector.load %arg2[%c0, %c0_0] : memref<32x128xbf16, #tpu.memory_space<vmem>>, vector<32x128xbf16>
    %c0_1 = arith.constant 0 : index
    %c0_2 = arith.constant 0 : index
    %1 = vector.load %arg4[%c0_1, %c0_2] : memref<128x64xbf16, #tpu.memory_space<vmem>>, vector<128x64xbf16>
    %c0_3 = arith.constant 0 : index
    %c0_4 = arith.constant 0 : index
    %2 = vector.load %arg6[%c0_3, %c0_4] : memref<64x128xbf16, #tpu.memory_space<vmem>>, vector<64x128xbf16>
    %c0_5 = arith.constant 0 : index
    %c0_6 = arith.constant 0 : index
    %3 = vector.load %arg1[%c0_5, %c0_6] : memref<8x32xf32, #tpu.memory_space<vmem>>, vector<8x32xf32>
    %4 = arith.truncf %3 : vector<8x32xf32> to vector<8x32xbf16>
    %cst = arith.constant dense<0.000000e+00> : vector<8x128xf32>
    %5 = tpu.matmul %4, %0, %cst {dimension_numbers = #tpu.dot_dimension_numbers<[1], [0], [0], [1], [0, 0, 1, 1], [], []>} : vector<8x32xbf16>, vector<32x128xbf16>, vector<8x128xf32> -> vector<8x128xf32>
    %6 = arith.truncf %5 : vector<8x128xf32> to vector<8x128xbf16>
    %c0_7 = arith.constant 0 : index
    %c0_8 = arith.constant 0 : index
    %7 = vector.load %arg3[%c0_7, %c0_8] : memref<1x128xbf16, #tpu.memory_space<vmem>>, vector<1x128xbf16>
    %8 = vector.broadcast %7 : vector<1x128xbf16> to vector<8x128xbf16>
    %9 = arith.addf %6, %8 : vector<8x128xbf16>
    %cst_9 = arith.constant 5.000000e-01 : bf16
    %10 = vector.broadcast %cst_9 : bf16 to vector<8x128xbf16>
    %11 = arith.mulf %10, %9 : vector<8x128xbf16>
    %12 = arith.mulf %9, %9 : vector<8x128xbf16>
    %13 = arith.mulf %12, %9 : vector<8x128xbf16>
    %cst_10 = arith.constant 4.467770e-02 : bf16
    %14 = vector.broadcast %cst_10 : bf16 to vector<8x128xbf16>
    %15 = arith.mulf %14, %13 : vector<8x128xbf16>
    %16 = arith.addf %9, %15 : vector<8x128xbf16>
    %cst_11 = arith.constant 7.968750e-01 : bf16
    %17 = vector.broadcast %cst_11 : bf16 to vector<8x128xbf16>
    %18 = arith.mulf %17, %16 : vector<8x128xbf16>
    %19 = math.tanh %18 : vector<8x128xbf16>
    %cst_12 = arith.constant 1.000000e+00 : bf16
    %20 = vector.broadcast %cst_12 : bf16 to vector<8x128xbf16>
    %21 = arith.addf %20, %19 : vector<8x128xbf16>
    %22 = arith.mulf %11, %21 : vector<8x128xbf16>
    %cst_13 = arith.constant dense<0.000000e+00> : vector<8x64xf32>
    %23 = tpu.matmul %22, %1, %cst_13 {dimension_numbers = #tpu.dot_dimension_numbers<[1], [0], [0], [1], [0, 0, 1, 1], [], []>} : vector<8x128xbf16>, vector<128x64xbf16>, vector<8x64xf32> -> vector<8x64xf32>
    %24 = arith.truncf %23 : vector<8x64xf32> to vector<8x64xbf16>
    %c0_14 = arith.constant 0 : index
    %c0_15 = arith.constant 0 : index
    %25 = vector.load %arg5[%c0_14, %c0_15] : memref<1x64xbf16, #tpu.memory_space<vmem>>, vector<1x64xbf16>
    %26 = vector.broadcast %25 : vector<1x64xbf16> to vector<8x64xbf16>
    %27 = arith.addf %24, %26 : vector<8x64xbf16>
    %cst_16 = arith.constant 5.000000e-01 : bf16
    %28 = vector.broadcast %cst_16 : bf16 to vector<8x64xbf16>
    %29 = arith.mulf %28, %27 : vector<8x64xbf16>
    %30 = arith.mulf %27, %27 : vector<8x64xbf16>
    %31 = arith.mulf %30, %27 : vector<8x64xbf16>
    %cst_17 = arith.constant 4.467770e-02 : bf16
    %32 = vector.broadcast %cst_17 : bf16 to vector<8x64xbf16>
    %33 = arith.mulf %32, %31 : vector<8x64xbf16>
    %34 = arith.addf %27, %33 : vector<8x64xbf16>
    %cst_18 = arith.constant 7.968750e-01 : bf16
    %35 = vector.broadcast %cst_18 : bf16 to vector<8x64xbf16>
    %36 = arith.mulf %35, %34 : vector<8x64xbf16>
    %37 = math.tanh %36 : vector<8x64xbf16>
    %cst_19 = arith.constant 1.000000e+00 : bf16
    %38 = vector.broadcast %cst_19 : bf16 to vector<8x64xbf16>
    %39 = arith.addf %38, %37 : vector<8x64xbf16>
    %40 = arith.mulf %29, %39 : vector<8x64xbf16>
    %cst_20 = arith.constant dense<0.000000e+00> : vector<8x128xf32>
    %41 = tpu.matmul %40, %2, %cst_20 {dimension_numbers = #tpu.dot_dimension_numbers<[1], [0], [0], [1], [0, 0, 1, 1], [], []>} : vector<8x64xbf16>, vector<64x128xbf16>, vector<8x128xf32> -> vector<8x128xf32>
    %c0_21 = arith.constant 0 : index
    %c0_22 = arith.constant 0 : index
    %42 = vector.load %arg7[%c0_21, %c0_22] : memref<1x128xf32, #tpu.memory_space<vmem>>, vector<1x128xf32>
    %43 = vector.broadcast %42 : vector<1x128xf32> to vector<8x128xf32>
    %44 = arith.addf %41, %43 : vector<8x128xf32>
    %c0_23 = arith.constant 0 : index
    %c0_24 = arith.constant 0 : index
    %45 = vector.load %arg8[%c0_23, %c0_24] : memref<8x128xf32, #tpu.memory_space<vmem>>, vector<8x128xf32>
    tpu.vector_store %arg8[%c0_23, %c0_24], %44 {strides = array<i32>} : memref<8x128xf32, #tpu.memory_space<vmem>>, vector<8x128xf32>,
    return
  }
  func.func @transform_0(%arg0: i32) -> (i32, i32) {
    %c0_i32 = arith.constant 0 : i32
    %c0_i32_0 = arith.constant 0 : i32
    return %arg0, %c0_i32 : i32, i32
  }
  func.func @transform_1(%arg0: i32) -> (i32, i32) {
    %c0_i32 = arith.constant 0 : i32
    %c0_i32_0 = arith.constant 0 : i32
    %c0_i32_1 = arith.constant 0 : i32
    return %c0_i32, %c0_i32_0 : i32, i32
  }
  func.func @transform_2(%arg0: i32) -> (i32, i32) {
    %c0_i32 = arith.constant 0 : i32
    %c0_i32_0 = arith.constant 0 : i32
    %c0_i32_1 = arith.constant 0 : i32
    return %c0_i32, %c0_i32_0 : i32, i32
  }
  func.func @transform_3(%arg0: i32) -> (i32, i32) {
    %c0_i32 = arith.constant 0 : i32
    %c0_i32_0 = arith.constant 0 : i32
    %c0_i32_1 = arith.constant 0 : i32
    return %c0_i32, %c0_i32_0 : i32, i32
  }
  func.func @transform_4(%arg0: i32) -> (i32, i32) {
    %c0_i32 = arith.constant 0 : i32
    %c0_i32_0 = arith.constant 0 : i32
    %c0_i32_1 = arith.constant 0 : i32
    return %c0_i32, %c0_i32_0 : i32, i32
  }
  func.func @transform_5(%arg0: i32) -> (i32, i32) {
    %c0_i32 = arith.constant 0 : i32
    %c0_i32_0 = arith.constant 0 : i32
    %c0_i32_1 = arith.constant 0 : i32
    return %c0_i32, %c0_i32_0 : i32, i32
  }
  func.func @transform_6(%arg0: i32) -> (i32, i32) {
    %c0_i32 = arith.constant 0 : i32
    %c0_i32_0 = arith.constant 0 : i32
    %c0_i32_1 = arith.constant 0 : i32
    return %c0_i32, %c0_i32_0 : i32, i32
  }
  func.func @transform_7(%arg0: i32) -> (i32, i32) {
    %c0_i32 = arith.constant 0 : i32
    %c0_i32_0 = arith.constant 0 : i32
    return %arg0, %c0_i32 : i32, i32
  }
}

</mosaic_0001>

<bundles_post_ra>
// kernel: tpu_custom_call.1
= control target key start
LH: loop header
LB: loop body
LE: loop exit
PB: predicated region body
PF: predicated region fallthrough
CT: control target
= control target key end

     0   :  { %v453_v1 = vmov 0.0   ;;  %vm454_vm0 = vmmov 0   ;;  %vm74_vm1 = vcmask 261120   ;;  %s579_s0 = inlined_call_operand.vmem [shape: f32[8,32], index: 0, kind: input, shape index: {}]   ;;  %s580_s1 = inlined_call_operand.vmem [shape: bf16[32,128], index: 1, kind: input, shape index: {}]   ;;  %s581_s2 = inlined_call_operand.vmem [shape: bf16[1,128], index: 2, kind: input, shape index: {}]   ;;  %s582_s3 = inlined_call_operand.vmem [shape: bf16[128,64], index: 3, kind: input, shape index: {}]   ;;  %s583_s4 = inlined_call_operand.vmem [shape: bf16[1,64], index: 4, kind: input, shape index: {}]   ;;  %s584_s5 = inlined_call_operand.vmem [shape: bf16[64,128], index: 5, kind: input, shape index: {}]   ;;  %s585_s6 = inlined_call_operand.vmem [shape: f32[1,128], index: 6, kind: input, shape index: {}]   ;;  %s586_s7 = inlined_call_operand.hbm [shape: f32[8,128], index: 7, kind: output, shape index: {}]  }
   0x1   :  { %v411_v0 = vld [vmem:[%s580_s1] sm:$0xff]   ;;  %368 = vmatprep.subr.bf16.mxu0 %v453_v1  ;;  %v412_v2 = vld [vmem:[%s580_s1 + $0x8] sm:$0xff]   ;;  %376 = vmatprep.subr.bf16.mxu1 %v453_v1 }
   0x2   :  { %369 = vmatpush3.bf16.msra.mxu0 %v411_v0  ;;  %372 = vmatprep.mubr.msk.bf16.mxu0 %vm454_vm0, %v453_v1  ;;  %v60_v3 = vld [vmem:[%s579_s0] sm:$0xff] }
   0x3   :  { %370 = vmatprep.subr.bf16.mxu0 %v453_v1  ;;  %392 = vmatprep.mubr.msk.bf16.mxu1 %vm454_vm0, %v453_v1  ;;  %v61_v4 = vpack.c.bf16 %v60_v3, %v60_v3 }
   0x6   :  { %371 = vmatpush3.bf16.msra.mxu0 %v412_v2 }
   0x7   :  { %396 = vmatprep.subr.bf16.mxu0 %v453_v1 }
   0x9   :  { %373 = vmatmul.mubr.msk.bf16.vlgmr.msra.gmra.mrb[0].mxu0 %vm74_vm1, %v61_v4 }
   0xa   :  { %404 = vmatprep.mubr.msk.bf16.mxu0 %vm454_vm0, %v453_v1 }
   0xb   :  { %12 = vsyncpa [#allocation3], 0  ;;  %v413_v5 = vld [vmem:[%s582_s3] sm:$0xff]   ;;  %v414_v6 = vld [vmem:[%s582_s3 + $0x8] sm:$0xff]   ;;  %v123_v13 = vlaneseq  ;;  %vm275_vm2 = vcmask 523264   ;;  %s455_s30 = smov [#allocation2]  }
   0xc   :  { %377 = vmatpush3.bf16.msra.mxu1 %v413_v5  ;;  %v415_v7 = vld [vmem:[%s582_s3 + $0x10] sm:$0xff]   ;;  %v416_v8 = vld [vmem:[%s582_s3 + $0x18] sm:$0xff]   ;;  %v417_v9 = vld [vmem:[%s582_s3 + $0x20] sm:$0xff]   ;;  %s326_s0 = sshll.u32 %s455_s30, 4  ;;  %s327_s0 = int_to_ptr.vmem [resolvable:$true] %s326_s0 }
   0xd   :  { %378 = vmatprep.subr.bf16.mxu1 %v453_v1  ;;  %v418_v10 = vld [vmem:[%s582_s3 + $0x28] sm:$0xff]   ;;  %v419_v11 = vld [vmem:[%s582_s3 + $0x30] sm:$0xff]   ;;  %v420_v12 = vld [vmem:[%s582_s3 + $0x38] sm:$0xff]   ;;  %v124_v14 = vshrl.u32 %v123_v13, 7  ;;  %s429_s8 = scalar_lea.vmem %s327_s0, 128  ;;  %p434_p1 = scmp.lt.s32.totalorder %s327_s0, %s327_s0 }
   0xe   :  { %v119_v15 = vld [vmem:[%s581_s2] sm:$0x1]  ;;  %v422_v35 = vld [vmem:[%s584_s5 + $0x8] sm:$0xff]   ;;  %v423_v36 = vld [vmem:[%s584_s5 + $0x10] sm:$0xff]   ;;  %p430_p0 = scmp.ne.s32.totalorder %s327_s0, %s429_s8  ;;  %p435_p2 = scmp.lt.s32.totalorder %s429_s8, %s429_s8 }
   0xf   :  { %v121_v16 = vpack.i.b16 %v119_v15, %v119_v15  ;;  %v125_v17 = vsub.s32 0, %v124_v14  ;;  %v421_v34 = vld [vmem:[%s584_s5] sm:$0xff]   ;;  %v424_v37 = vld [vmem:[%s584_s5 + $0x18] sm:$0xff]  }
  0x10   :  { %379 = vmatpush3.bf16.msra.mxu1 %v414_v6  ;;  %397 = vmatpush3.bf16.msra.mxu0 %v421_v34  ;;  %v226_v38 = vld [vmem:[%s583_s4] sm:$0x1]  ;;  %p436_p3 = por %p435_p2, %p434_p1 }
  0x11   :  { %380 = vmatprep.subr.bf16.mxu1 %v453_v1  ;;  %v126_v18 = vrot.slane %v121_v16, %v125_v17  ;;  %398 = vmatprep.subr.bf16.mxu0 %v453_v1  ;;  %v228_v39 = vpack.i.b16 %v226_v38, %v226_v38  ;;  %v345_v56 = vld [vmem:[%s585_s6] ss:$0 sm:$0xff] }
  0x12   :  { %p437_p4 = pnand %p436_p3, %p430_p0 }
  0x13   :  { %v233_v40 = vrot.slane %v228_v39, %v125_v17 }
  0x14   :  { %381 = vmatpush3.bf16.msra.mxu1 %v415_v7  ;;  %399 = vmatpush3.bf16.msra.mxu0 %v422_v35 }
  0x15   :  { %382 = vmatprep.subr.bf16.mxu1 %v453_v1  ;;  %400 = vmatprep.subr.bf16.mxu0 %v453_v1 }
  0x18   :  { %383 = vmatpush3.bf16.msra.mxu1 %v416_v8  ;;  %401 = vmatpush3.bf16.msra.mxu0 %v423_v36 }
  0x19   :  { %384 = vmatprep.subr.bf16.mxu1 %v453_v1  ;;  %402 = vmatprep.subr.bf16.mxu0 %v453_v1 }
  0x1c   :  { %385 = vmatpush3.bf16.msra.mxu1 %v417_v9  ;;  %403 = vmatpush3.bf16.msra.mxu0 %v424_v37 }
  0x1d   :  { %386 = vmatprep.subr.bf16.mxu1 %v453_v1 }
  0x20   :  { %387 = vmatpush3.bf16.msra.mxu1 %v418_v10 }
  0x21   :  { %388 = vmatprep.subr.bf16.mxu1 %v453_v1 }
  0x24   :  { %389 = vmatpush3.bf16.msra.mxu1 %v419_v11 }
  0x25   :  { %390 = vmatprep.subr.bf16.mxu1 %v453_v1 }
  0x28   :  { %391 = vmatpush3.bf16.msra.mxu1 %v420_v12 }
  0xdc   :  { %v112_v19 = vpop.f32.mrb[0].mxu0 }
  0xdd   :  { %v118_v20 = vpack.c.bf16 %v112_v19, %v112_v19  ;;  %v374_v21 = vpop.f32.mrb[1].mxu0 }
  0xde   :  { %v115_v22 = vpop.f32.mrb[2].mxu0 }
  0xdf   :  { %v127_v23 = vadd.bf16 %v126_v18, %v118_v20  ;;  %v375_v24 = vpop.f32.mrb[3].mxu0 }
  0xe1   :  { %v129_v25 = vmul.bf16 %v127_v23, %v127_v23  ;;  %v128_v31 = vmul.bf16 1056980736, %v127_v23 }
  0xe3   :  { %v130_v26 = vmul.bf16 %v129_v25, %v127_v23 }
  0xe5   :  { %v131_v27 = vmul.bf16 1027030327, %v130_v26 }
  0xe7   :  { %v132_v28 = vadd.bf16 %v131_v27, %v127_v23 }
  0xe9   :  { %v133_v29 = vmul.bf16 1061961548, %v132_v28 }
  0xeb   :  { %425 = vtanh.bf16 %v133_v29 }
  0xf6   :  { %v426_v30 = vpop.eup %425 }
  0xf7   :  { %v135_v32 = vadd.bf16 1065369472, %v426_v30 }
  0xf9   :  { %v136_v33 = vmul.bf16 %v135_v32, %v128_v31 }
  0xfb   :  { %393 = vmatmul.mubr.bf16.vlgmr.msra.gmra.mrb[0].mxu1 %v136_v33 }
 0x1ce   :  { %v219_v41 = vpop.f32.mrb[0].mxu1 }
 0x1cf   :  { %v225_v42 = vpack.c.bf16 %v219_v41, %v219_v41  ;;  %v394_v43 = vpop.f32.mrb[1].mxu1 }
 0x1d0   :  { %v222_v44 = vpop.f32.mrb[2].mxu1 }
 0x1d1   :  { %v234_v45 = vadd.bf16 %v233_v40, %v225_v42  ;;  %v395_v46 = vpop.f32.mrb[3].mxu1 }
 0x1d3   :  { %v236_v47 = vmul.bf16 %v234_v45, %v234_v45  ;;  %v235_v53 = vmul.bf16 1056980736, %v234_v45 }
 0x1d5   :  { %v237_v48 = vmul.bf16 %v236_v47, %v234_v45 }
 0x1d7   :  { %v238_v49 = vmul.bf16 1027030327, %v237_v48 }
 0x1d9   :  { %v239_v50 = vadd.bf16 %v238_v49, %v234_v45 }
 0x1db   :  { %v240_v51 = vmul.bf16 1061961548, %v239_v50 }
 0x1dd   :  { %427 = vtanh.bf16 %v240_v51 }
 0x1e8   :  { %v428_v52 = vpop.eup %427 }
 0x1e9   :  { %v242_v54 = vadd.bf16 1065369472, %v428_v52 }
 0x1eb   :  { %v243_v55 = vmul.bf16 %v242_v54, %v235_v53 }
 0x1ed   :  { %405 = vmatmul.mubr.msk.bf16.vlgmr.msra.gmra.mrb[4].mxu0 %vm275_vm2, %v243_v55 }
 0x2c0   :  { %v313_v57 = vpop.f32.mrb[4].mxu0 }
 0x2c1   :  { %v314_v58 = vadd.f32 %v345_v56, %v313_v57  ;;  %v406_v59 = vpop.f32.mrb[5].mxu0 }
 0x2c2   :  { %v316_v60 = vpop.f32.mrb[6].mxu0 }
 0x2c3   :  { %319 = vst [vmem:[#allocation2] sm:$0xff] %v314_v58  ;;  %v407_v61 = vpop.f32.mrb[7].mxu0 }
 0x2c4   :  { %440 = shalt.err (!%p437_p4)
}
 0x2c5   :  { %s441_s6 = scalar_lea.hbm %s586_s7, 128 }
 0x2c6   :  { %p442_p5 = scmp.ne.s32.totalorder %s586_s7, %s441_s6  ;;  %p445_p6 = scmp.lt.u32.totalorder %s441_s6, %s586_s7 }
 0x2c8   :  { %p447_p7 = pnand %p445_p6, %p442_p5 }
 0x2ca   :  { %450 = shalt.err (!%p447_p7)
}
 0x2cb   :  { %329 = dma.vmem_to_hbm [thread:$0]  %s327_s0, 128, %s586_s7, [#allocation3]  }
 0x2cc   :  { %451 = dma.done.wait [#allocation3], 128  }
 0x2cd   :  { %452 = vsyncadd [#allocation3], 4294967168 }
 0x2ce   :  { %333 = vsyncpa [#allocation3], 1 }

</bundles_post_ra>
